<compile_context>
chip_gen: v7x
topology: tpu7x:2x2x1
jax: 0.10.0
libtpu: 0.0.40
codegen_flags: <defaults>
</compile_context>

<pallas_src>
import functools
import numpy as np
import jax
import jax.numpy as jnp
from jax import lax
from jax.experimental import pallas as pl
from jax.experimental.pallas import tpu as pltpu


# ----------------------------- static interpolation helpers -----------------------------

def _interp_matrix_np(out_size, in_size, scale):
    """1-D bilinear interpolation matrix matching F.interpolate(mode='bilinear',
    align_corners=False): half-pixel centers, source coordinate clamped at 0."""
    i = np.arange(out_size, dtype=np.float64)
    src = np.maximum((i + 0.5) / scale - 0.5, 0.0)
    i0 = np.minimum(np.floor(src).astype(np.int64), in_size - 1)
    i1 = np.minimum(i0 + 1, in_size - 1)
    l1 = src - i0
    l0 = 1.0 - l1
    R = np.zeros((out_size, in_size), dtype=np.float32)
    R[np.arange(out_size), i0] += l0.astype(np.float32)
    R[np.arange(out_size), i1] += l1.astype(np.float32)
    return R


def _upsample_matrix(Hc, Wc, W, Ho, Wo, scale):
    """Static (Hc*W, Ho*Wo) matrix M with M[h*W+w, oh*Wo+ow] = Rh[oh,h]*Rw[ow,w]
    (zero for the w >= Wc "garbage" columns of the full-width conv rows), so the whole
    bilinear upsample is a single deep-contraction GEMM:  up = z @ M."""
    Rh = _interp_matrix_np(Ho, Hc, scale)            # (Ho, Hc)
    Rw = _interp_matrix_np(Wo, Wc, scale)            # (Wo, Wc)
    M = np.zeros((Hc, W, Ho, Wo), dtype=np.float32)
    M[:, :Wc] = np.einsum('oh,pw->hwop', Rh, Rw)
    return M.reshape(Hc * W, Ho * Wo)


def _pick_channel_tile(cout, lane_width, bytes_per_elem=14, vmem_budget=8 << 20):
    """Channel tile for kernel B: must divide Cout and be a multiple of 16 (bf16 sublane
    packing) unless it is the full Cout; double-buffered blocks must fit `vmem_budget`."""
    cap = max(1, vmem_budget // max(1, 2 * bytes_per_elem * lane_width))
    cands = [t for t in range(1, cout + 1)
             if cout % t == 0 and (t == cout or t % 16 == 0)]
    fits = [t for t in cands if t <= cap]
    return max(fits) if fits else min(cands)


# ----------------------------------- Pallas kernels -----------------------------------

def _conv_up_pre_kernel(scal_ref, x_ref, w_ref, b_ref, m_ref, y_ref,
                        pre_ref, stats_ref, *, W, K, HcW):
    """Per-batch fused: conv(wx*x)+bias -> bilinear upsample -> pre = wy*y + up, plus the
    per-batch per-channel sum / sum^2 of `pre` for the BatchNorm batch statistics.
    Everything is channel-major (channels on sublanes, flattened spatial on lanes).

    x_ref:     (1, Cin, H*W + K - 1)  bf16  (NCHW x, spatial flattened, zero-padded tail)
    w_ref:     (Cout, K*K*Cin)        bf16  (conv weight, cols ordered (di, dj, cin))
    b_ref:     (Cout, 1)              f32
    m_ref:     (Hc*W, Ho*Wo)          bf16  (kron(Rh, Rw) bilinear-upsample matrix)
    y_ref:     (1, Cout, Ho*Wo)       f32
    pre_ref:   (1, Cout, Ho*Wo)       bf16  output
    stats_ref: (1, Cout, 2)           f32   output [sum, sum of squares]
    """
    f32 = jnp.float32
    bf16 = jnp.bfloat16
    wx = scal_ref[1]
    wy = scal_ref[3]

    # --- in-kernel im2col: K*K lane-shifted views stacked along sublanes (no HBM blowup).
    # Slice / concatenate on 32-bit data for robust layouts, then cast to bf16 once.
    xf = x_ref[0].astype(f32)                                     # (Cin, H*W + K - 1)
    taps = [xf[:, di * W + dj: di * W + dj + HcW]
            for di in range(K) for dj in range(K)]                # K*K x (Cin, Hc*W)
    xcat = jnp.concatenate(taps, axis=0).astype(bf16)             # (K*K*Cin, Hc*W)

    # --- conv as ONE GEMM (contraction K*K*Cin), channel-major lane-dense output.
    z = jnp.dot(w_ref[...], xcat, preferred_element_type=f32)     # (Cout, Hc*W)
    z = z * wx + b_ref[...]                                       # conv(wx*x) + bias

    # --- whole bilinear upsample as ONE GEMM against the static kron(Rh, Rw) matrix.
    # bf16 operands / f32 accumulation (documented: ~1e-3 rel error vs the f32 reference).
    up = jnp.dot(z.astype(bf16), m_ref[...], preferred_element_type=f32)  # (Cout, Ho*Wo)

    # --- pre-activation + BN batch-stat partials (2 lane reductions on the full block).
    pre = wy * y_ref[0] + up                                      # (Cout, Ho*Wo) f32
    pre_ref[0] = pre.astype(bf16)
    s = jnp.sum(pre, axis=1, keepdims=True)
    ss = jnp.sum(pre * pre, axis=1, keepdims=True)
    stats_ref[0] = jnp.concatenate([s, ss], axis=1)               # (Cout, 2)


def _bn_combine_kernel(scal_ref, scale_ref, shift_ref, pre_ref, y_ref, ypre_ref, out_ref):
    """BatchNorm-normalize + ReLU + weighted combine on channel-major (Ct, Ho*Wo) blocks.

    scale_ref / shift_ref: (Ct, 1) per-channel gamma*inv_std and beta - mean*gamma*inv_std.
    """
    delta = scal_ref[0]
    wyp = scal_ref[2]
    wy = scal_ref[3]
    act = jnp.maximum(pre_ref[0].astype(jnp.float32) * scale_ref[...] + shift_ref[...], 0.0)
    out_ref[0] = (wyp * ypre_ref[0]
                  + (2.0 * delta * wy) * y_ref[0]
                  + (2.0 * delta) * act)


# ------------------------------------- wrapper -------------------------------------

def c_br_forward(x, y_pre, y, delta, weight_x, weight_y_pre, weight_y, scale,
                 conv_w, conv_b, bn_gamma, bn_beta, kernel_size=3):
    f32 = jnp.float32
    bf16 = jnp.bfloat16
    B, Cin, H, W = x.shape
    Cout = conv_w.shape[0]
    K = kernel_size
    Hc, Wc = H - K + 1, W - K + 1                     # conv: stride 1, padding 0
    Ho, Wo = Hc * scale, Wc * scale
    HcW, HoWo, HWp = Hc * W, Ho * Wo, H * W + K - 1
    assert y.shape == (B, Cout, Ho, Wo) and y_pre.shape == (B, Cout, Ho, Wo)

    scal = jnp.array([delta, weight_x, weight_y_pre, weight_y], dtype=f32)

    # ---- layout prep: everything stays channel-major (free reshapes of NCHW, no transposes)
    x_cm = jnp.pad(x.astype(bf16).reshape(B, Cin, H * W), ((0, 0), (0, 0), (0, K - 1)))
    y_cm = y.astype(f32).reshape(B, Cout, HoWo)
    ypre_cm = y_pre.astype(f32).reshape(B, Cout, HoWo)

    # conv weight -> (Cout, K*K*Cin) bf16, columns ordered (di, dj, cin); bias -> (Cout, 1)
    wmat = conv_w.astype(f32).transpose(0, 2, 3, 1).reshape(Cout, K * K * Cin).astype(bf16)
    bias = conv_b.astype(f32).reshape(Cout, 1)

    # static kron(Rh, Rw) bilinear-upsample matrix (~350 KB bf16 at this size)
    # TODO(synk): for large H*W this dense matrix and the whole-image-per-batch blocks should
    # be replaced by a conv-row-tiled grid (Rw GEMM + 2-tap Rh FMA per row tile).
    m_up = jnp.asarray(_upsample_matrix(Hc, Wc, W, Ho, Wo, scale), dtype=bf16)

    smem = pl.BlockSpec(memory_space=pltpu.MemorySpace.SMEM)
    cparams_a = pltpu.CompilerParams(dimension_semantics=("parallel",),
                                     vmem_limit_bytes=32 * 1024 * 1024)

    # -------- kernel A: fused conv + upsample + pre-activation + BN partial stats --------
    kern_a = functools.partial(_conv_up_pre_kernel, W=W, K=K, HcW=HcW)
    pre, stats = pl.pallas_call(
        kern_a,
        grid=(B,),
        in_specs=[
            smem,                                                    # scal
            pl.BlockSpec((1, Cin, HWp), lambda b: (b, 0, 0)),        # x (per batch)
            pl.BlockSpec((Cout, K * K * Cin), lambda b: (0, 0)),     # conv weight
            pl.BlockSpec((Cout, 1), lambda b: (0, 0)),               # bias
            pl.BlockSpec((HcW, HoWo), lambda b: (0, 0)),             # kron(Rh, Rw)
            pl.BlockSpec((1, Cout, HoWo), lambda b: (b, 0, 0)),      # y (per batch)
        ],
        out_specs=(
            pl.BlockSpec((1, Cout, HoWo), lambda b: (b, 0, 0)),      # pre (bf16)
            pl.BlockSpec((1, Cout, 2), lambda b: (b, 0, 0)),         # [sum, sumsq]
        ),
        out_shape=(
            jax.ShapeDtypeStruct((B, Cout, HoWo), bf16),
            jax.ShapeDtypeStruct((B, Cout, 2), f32),
        ),
        compiler_params=cparams_a,
    )(scal, x_cm, wmat, bias, m_up, y_cm)

    # -------- BN batch-stat finalize (O(Cout) work in XLA) --------
    # TODO(synk): E[x^2]-E[x]^2 in f32 can cancel when |mean| >> std; use a shifted/Welford
    # accumulation inside kernel A if that regime matters for this model.
    n = B * Ho * Wo
    mean = jnp.sum(stats[:, :, 0], axis=0) / n
    var = jnp.maximum(jnp.sum(stats[:, :, 1], axis=0) / n - mean * mean, 0.0)
    inv = lax.rsqrt(var + 1e-5)                                      # biased var (PyTorch BN)
    scale_c = (bn_gamma.astype(f32) * inv).reshape(Cout, 1)
    shift_c = (bn_beta.astype(f32) - mean * bn_gamma.astype(f32) * inv).reshape(Cout, 1)

    # -------- kernel B: BN-normalize + ReLU + combine on channel-major blocks --------
    TC = _pick_channel_tile(Cout, HoWo)
    out = pl.pallas_call(
        _bn_combine_kernel,
        grid=(B, Cout // TC),
        in_specs=[
            smem,                                                    # scal
            pl.BlockSpec((TC, 1), lambda b, c: (c, 0)),              # gamma*inv_std
            pl.BlockSpec((TC, 1), lambda b, c: (c, 0)),              # beta - mean*gamma*inv
            pl.BlockSpec((1, TC, HoWo), lambda b, c: (b, c, 0)),     # pre (bf16)
            pl.BlockSpec((1, TC, HoWo), lambda b, c: (b, c, 0)),     # y
            pl.BlockSpec((1, TC, HoWo), lambda b, c: (b, c, 0)),     # y_pre
        ],
        out_specs=pl.BlockSpec((1, TC, HoWo), lambda b, c: (b, c, 0)),
        out_shape=jax.ShapeDtypeStruct((B, Cout, HoWo), f32),
        compiler_params=pltpu.CompilerParams(
            dimension_semantics=("parallel", "parallel"),
            vmem_limit_bytes=32 * 1024 * 1024),
    )(scal, scale_c, shift_c, pre, y_cm, ypre_cm)

    return out.reshape(B, Cout, Ho, Wo)                              # NCHW, no transpose


# ----------------------------- pure-JAX reference (same math) -----------------------------

def c_br_reference(x, y_pre, y, delta, weight_x, weight_y_pre, weight_y, scale,
                   conv_w, conv_b, bn_gamma, bn_beta, kernel_size=3):
    f32 = jnp.float32
    B, Cin, H, W = x.shape
    Cout = conv_w.shape[0]
    k = kernel_size
    Hc, Wc = H - k + 1, W - k + 1
    Ho, Wo = Hc * scale, Wc * scale
    z = jax.lax.conv_general_dilated(
        (weight_x * x).astype(f32), conv_w.astype(f32),
        window_strides=(1, 1), padding='VALID',
        dimension_numbers=('NCHW', 'OIHW', 'NCHW'),
        precision=jax.lax.Precision.HIGHEST) + conv_b.reshape(1, Cout, 1, 1)
    Rh = jnp.asarray(_interp_matrix_np(Ho, Hc, scale))
    Rw = jnp.asarray(_interp_matrix_np(Wo, Wc, scale))
    up = jnp.einsum('oh,bchw,pw->bcop', Rh, z, Rw, precision=jax.lax.Precision.HIGHEST)
    pre = weight_y * y.astype(f32) + up
    mean = pre.mean(axis=(0, 2, 3), keepdims=True)
    var = ((pre - mean) ** 2).mean(axis=(0, 2, 3), keepdims=True)
    normed = ((pre - mean) / jnp.sqrt(var + 1e-5)) * bn_gamma.reshape(1, Cout, 1, 1) \
             + bn_beta.reshape(1, Cout, 1, 1)
    act = jnp.maximum(normed, 0.0)
    return weight_y_pre * y_pre.astype(f32) + 2.0 * delta * weight_y * y.astype(f32) \
           + 2.0 * delta * act


# --------------------------------------- main ---------------------------------------

if __name__ == "__main__":
    key = jax.random.PRNGKey(0)
    kx, kyp, ky, kw, kb = jax.random.split(key, 5)

    B, Cin, Cout, H, W, K, scale = 2, 4, 8, 16, 16, 3, 2
    Hc, Wc = H - K + 1, W - K + 1
    Ho, Wo = Hc * scale, Wc * scale

    x = jax.random.normal(kx, (B, Cin, H, W), jnp.float32)
    y_pre = jax.random.normal(kyp, (B, Cout, Ho, Wo), jnp.float32)
    y = jax.random.normal(ky, (B, Cout, Ho, Wo), jnp.float32)

    # deterministic synthetic parameters (module __init__ shapes)
    conv_w = 0.1 * jax.random.normal(kw, (Cout, Cin, K, K), jnp.float32)   # Conv2d weight
    conv_b = 0.1 * jax.random.normal(kb, (Cout,), jnp.float32)             # Conv2d bias
    bn_gamma = jnp.ones((Cout,), jnp.float32)                              # fresh BatchNorm2d
    bn_beta = jnp.zeros((Cout,), jnp.float32)

    delta, weight_x, weight_y_pre, weight_y = 0.1, 0.5, 0.9, 0.7

    out = c_br_forward(x, y_pre, y, delta, weight_x, weight_y_pre, weight_y, scale,
                       conv_w, conv_b, bn_gamma, bn_beta, kernel_size=K)
    out = jax.block_until_ready(out)

    ref = c_br_reference(x, y_pre, y, delta, weight_x, weight_y_pre, weight_y, scale,
                         conv_w, conv_b, bn_gamma, bn_beta, kernel_size=K)

    assert out.shape == (B, Cout, Ho, Wo)
    assert bool(jnp.all(jnp.isfinite(out)))
    assert bool(jnp.allclose(out, ref, rtol=2e-2, atol=2e-2)), \
        f"max abs diff {float(jnp.max(jnp.abs(out - ref)))}"
    print("KERNEL_OK")
</pallas_src>

<mosaic_0001>
module attributes {stable_mosaic.version = 11 : i64} {
  func.func @_conv_up_pre_kernel(%arg0: i32, %arg1: memref<4xf32, #tpu.memory_space<smem>>, %arg2: memref<1x4x258xbf16, #tpu.memory_space<vmem>>, %arg3: memref<8x36xbf16, #tpu.memory_space<vmem>>, %arg4: memref<8x1xf32, #tpu.memory_space<vmem>>, %arg5: memref<224x784xbf16, #tpu.memory_space<vmem>>, %arg6: memref<1x8x784xf32, #tpu.memory_space<vmem>>, %arg7: memref<1x8x784xbf16, #tpu.memory_space<vmem>>, %arg8: memref<1x8x2xf32, #tpu.memory_space<vmem>>) attributes {dimension_semantics = [#tpu.dimension_semantics<parallel>], iteration_bounds = array<i64: 2>, scalar_prefetch = 0 : i64, scratch_operands = 0 : i64, tpu.core_type = #tpu.core_type<tc>, window_params = [{transform_indices = @transform_0, window_bounds = array<i64: 4>}, {transform_indices = @transform_1, window_bounds = array<i64: 1, 4, 258>}, {pipeline_mode = #tpu.pipeline_mode<synchronous>, transform_indices = @transform_2, window_bounds = array<i64: 8, 36>}, {pipeline_mode = #tpu.pipeline_mode<synchronous>, transform_indices = @transform_3, window_bounds = array<i64: 8, 1>}, {pipeline_mode = #tpu.pipeline_mode<synchronous>, transform_indices = @transform_4, window_bounds = array<i64: 224, 784>}, {transform_indices = @transform_5, window_bounds = array<i64: 1, 8, 784>}, {transform_indices = @transform_6, window_bounds = array<i64: 1, 8, 784>}, {transform_indices = @transform_7, window_bounds = array<i64: 1, 8, 2>}]} {
    %c1 = arith.constant 1 : index
    %0 = memref.load %arg1[%c1] : memref<4xf32, #tpu.memory_space<smem>>
    %c3 = arith.constant 3 : index
    %1 = memref.load %arg1[%c3] : memref<4xf32, #tpu.memory_space<smem>>
    %c0 = arith.constant 0 : index
    %c0_0 = arith.constant 0 : index
    %c0_1 = arith.constant 0 : index
    %2 = vector.load %arg2[%c0, %c0_0, %c0_1] : memref<1x4x258xbf16, #tpu.memory_space<vmem>>, vector<1x4x258xbf16>
    %3 = vector.shape_cast %2 : vector<1x4x258xbf16> to vector<4x258xbf16>
    %4 = arith.extf %3 : vector<4x258xbf16> to vector<4x258xf32>
    %5 = vector.extract_strided_slice %4 {offsets = [0, 0], sizes = [4, 224], strides = [1, 1]} : vector<4x258xf32> to vector<4x224xf32>
    %6 = vector.extract_strided_slice %4 {offsets = [0, 1], sizes = [4, 224], strides = [1, 1]} : vector<4x258xf32> to vector<4x224xf32>
    %7 = vector.extract_strided_slice %4 {offsets = [0, 2], sizes = [4, 224], strides = [1, 1]} : vector<4x258xf32> to vector<4x224xf32>
    %8 = vector.extract_strided_slice %4 {offsets = [0, 16], sizes = [4, 224], strides = [1, 1]} : vector<4x258xf32> to vector<4x224xf32>
    %9 = vector.extract_strided_slice %4 {offsets = [0, 17], sizes = [4, 224], strides = [1, 1]} : vector<4x258xf32> to vector<4x224xf32>
    %10 = vector.extract_strided_slice %4 {offsets = [0, 18], sizes = [4, 224], strides = [1, 1]} : vector<4x258xf32> to vector<4x224xf32>
    %11 = vector.extract_strided_slice %4 {offsets = [0, 32], sizes = [4, 224], strides = [1, 1]} : vector<4x258xf32> to vector<4x224xf32>
    %12 = vector.extract_strided_slice %4 {offsets = [0, 33], sizes = [4, 224], strides = [1, 1]} : vector<4x258xf32> to vector<4x224xf32>
    %13 = vector.extract_strided_slice %4 {offsets = [0, 34], sizes = [4, 224], strides = [1, 1]} : vector<4x258xf32> to vector<4x224xf32>
    %14 = tpu.concatenate %5, %6, %7, %8, %9, %10, %11, %12, %13 in 0 : vector<4x224xf32>, vector<4x224xf32>, vector<4x224xf32>, vector<4x224xf32>, vector<4x224xf32>, vector<4x224xf32>, vector<4x224xf32>, vector<4x224xf32>, vector<4x224xf32> -> vector<36x224xf32>
    %15 = arith.truncf %14 : vector<36x224xf32> to vector<36x224xbf16>
    %c0_2 = arith.constant 0 : index
    %c0_3 = arith.constant 0 : index
    %16 = vector.load %arg3[%c0_2, %c0_3] : memref<8x36xbf16, #tpu.memory_space<vmem>>, vector<8x36xbf16>
    %cst = arith.constant dense<0.000000e+00> : vector<8x224xf32>
    %17 = tpu.matmul %16, %15, %cst {dimension_numbers = #tpu.dot_dimension_numbers<[1], [0], [0], [1], [0, 0, 1, 1], [], []>} : vector<8x36xbf16>, vector<36x224xbf16>, vector<8x224xf32> -> vector<8x224xf32>
    %18 = vector.broadcast %0 : f32 to vector<8x224xf32>
    %19 = arith.mulf %17, %18 : vector<8x224xf32>
    %c0_4 = arith.constant 0 : index
    %c0_5 = arith.constant 0 : index
    %20 = vector.load %arg4[%c0_4, %c0_5] : memref<8x1xf32, #tpu.memory_space<vmem>>, vector<8x1xf32>
    %21 = vector.broadcast %20 : vector<8x1xf32> to vector<8x224xf32>
    %22 = arith.addf %19, %21 : vector<8x224xf32>
    %23 = arith.truncf %22 : vector<8x224xf32> to vector<8x224xbf16>
    %c0_6 = arith.constant 0 : index
    %c0_7 = arith.constant 0 : index
    %24 = vector.load %arg5[%c0_6, %c0_7] : memref<224x784xbf16, #tpu.memory_space<vmem>>, vector<224x784xbf16>
    %cst_8 = arith.constant dense<0.000000e+00> : vector<8x784xf32>
    %25 = tpu.matmul %23, %24, %cst_8 {dimension_numbers = #tpu.dot_dimension_numbers<[1], [0], [0], [1], [0, 0, 1, 1], [], []>} : vector<8x224xbf16>, vector<224x784xbf16>, vector<8x784xf32> -> vector<8x784xf32>
    %c0_9 = arith.constant 0 : index
    %c0_10 = arith.constant 0 : index
    %c0_11 = arith.constant 0 : index
    %26 = vector.load %arg6[%c0_9, %c0_10, %c0_11] : memref<1x8x784xf32, #tpu.memory_space<vmem>>, vector<1x8x784xf32>
    %27 = vector.shape_cast %26 : vector<1x8x784xf32> to vector<8x784xf32>
    %28 = vector.broadcast %1 : f32 to vector<8x784xf32>
    %29 = arith.mulf %28, %27 : vector<8x784xf32>
    %30 = arith.addf %29, %25 : vector<8x784xf32>
    %31 = arith.truncf %30 : vector<8x784xf32> to vector<8x784xbf16>
    %c0_12 = arith.constant 0 : index
    %c0_13 = arith.constant 0 : index
    %c0_14 = arith.constant 0 : index
    %32 = vector.load %arg7[%c0_12, %c0_13, %c0_14] : memref<1x8x784xbf16, #tpu.memory_space<vmem>>, vector<1x8x784xbf16>
    %33 = vector.shape_cast %32 : vector<1x8x784xbf16> to vector<8x784xbf16>
    %34 = vector.shape_cast %31 : vector<8x784xbf16> to vector<1x8x784xbf16>
    tpu.vector_store %arg7[%c0_12, %c0_13, %c0_14], %34 {strides = array<i32>} : memref<1x8x784xbf16, #tpu.memory_space<vmem>>, vector<1x8x784xbf16>,
    %cst_15 = arith.constant dense<0.000000e+00> : vector<8xf32>
    %35 = vector.multi_reduction <add>, %30, %cst_15 [1] : vector<8x784xf32> to vector<8xf32>
    %36 = vector.shape_cast %35 : vector<8xf32> to vector<8x1xf32>
    %37 = arith.mulf %30, %30 : vector<8x784xf32>
    %cst_16 = arith.constant dense<0.000000e+00> : vector<8xf32>
    %38 = vector.multi_reduction <add>, %37, %cst_16 [1] : vector<8x784xf32> to vector<8xf32>
    %39 = vector.shape_cast %38 : vector<8xf32> to vector<8x1xf32>
    %40 = tpu.concatenate %36, %39 in 1 : vector<8x1xf32>, vector<8x1xf32> -> vector<8x2xf32>
    %c0_17 = arith.constant 0 : index
    %c0_18 = arith.constant 0 : index
    %c0_19 = arith.constant 0 : index
    %41 = vector.load %arg8[%c0_17, %c0_18, %c0_19] : memref<1x8x2xf32, #tpu.memory_space<vmem>>, vector<1x8x2xf32>
    %42 = vector.shape_cast %41 : vector<1x8x2xf32> to vector<8x2xf32>
    %43 = vector.shape_cast %40 : vector<8x2xf32> to vector<1x8x2xf32>
    tpu.vector_store %arg8[%c0_17, %c0_18, %c0_19], %43 {strides = array<i32>} : memref<1x8x2xf32, #tpu.memory_space<vmem>>, vector<1x8x2xf32>,
    return
  }
  func.func @transform_0(%arg0: i32) -> i32 {
    %c0_i32 = arith.constant 0 : i32
    %c0_i32_0 = arith.constant 0 : i32
    return %c0_i32 : i32
  }
  func.func @transform_1(%arg0: i32) -> (i32, i32, i32) {
    %c0_i32 = arith.constant 0 : i32
    %c0_i32_0 = arith.constant 0 : i32
    %c0_i32_1 = arith.constant 0 : i32
    return %arg0, %c0_i32, %c0_i32_0 : i32, i32, i32
  }
  func.func @transform_2(%arg0: i32) -> (i32, i32) {
    %c0_i32 = arith.constant 0 : i32
    %c0_i32_0 = arith.constant 0 : i32
    %c0_i32_1 = arith.constant 0 : i32
    return %c0_i32, %c0_i32_0 : i32, i32
  }
  func.func @transform_3(%arg0: i32) -> (i32, i32) {
    %c0_i32 = arith.constant 0 : i32
    %c0_i32_0 = arith.constant 0 : i32
    %c0_i32_1 = arith.constant 0 : i32
    return %c0_i32, %c0_i32_0 : i32, i32
  }
  func.func @transform_4(%arg0: i32) -> (i32, i32) {
    %c0_i32 = arith.constant 0 : i32
    %c0_i32_0 = arith.constant 0 : i32
    %c0_i32_1 = arith.constant 0 : i32
    return %c0_i32, %c0_i32_0 : i32, i32
  }
  func.func @transform_5(%arg0: i32) -> (i32, i32, i32) {
    %c0_i32 = arith.constant 0 : i32
    %c0_i32_0 = arith.constant 0 : i32
    %c0_i32_1 = arith.constant 0 : i32
    return %arg0, %c0_i32, %c0_i32_0 : i32, i32, i32
  }
  func.func @transform_6(%arg0: i32) -> (i32, i32, i32) {
    %c0_i32 = arith.constant 0 : i32
    %c0_i32_0 = arith.constant 0 : i32
    %c0_i32_1 = arith.constant 0 : i32
    return %arg0, %c0_i32, %c0_i32_0 : i32, i32, i32
  }
  func.func @transform_7(%arg0: i32) -> (i32, i32, i32) {
    %c0_i32 = arith.constant 0 : i32
    %c0_i32_0 = arith.constant 0 : i32
    %c0_i32_1 = arith.constant 0 : i32
    return %arg0, %c0_i32, %c0_i32_0 : i32, i32, i32
  }
}

</mosaic_0001>

<bundles_post_ra>
// kernel: tpu_custom_call.1
= control target key start
LH: loop header
LB: loop body
LE: loop exit
PB: predicated region body
PF: predicated region fallthrough
CT: control target
= control target key end

     0   :  { %s2436_s0 = inlined_call_operand.hbm [shape: f32[4], index: 0, kind: input, shape index: {}]   ;;  %s2437_s1 = inlined_call_operand.vmem [shape: bf16[2,4,258], index: 1, kind: input, shape index: {}]   ;;  %s2438_s2 = inlined_call_operand.vmem [shape: bf16[8,36], index: 2, kind: input, shape index: {}]   ;;  %s2439_s3 = inlined_call_operand.vmem [shape: f32[8,1], index: 3, kind: input, shape index: {}]   ;;  %s2440_s4 = inlined_call_operand.hbm [shape: bf16[224,784], index: 4, kind: input, shape index: {}]   ;;  %s2441_s5 = inlined_call_operand.hbm [shape: f32[2,8,784], index: 5, kind: input, shape index: {}]   ;;  %s2442_s6 = inlined_call_operand.hbm [shape: bf16[2,8,784], index: 6, kind: output, shape index: {0}]   ;;  %s2443_s7 = inlined_call_operand.vmem [shape: f32[2,8,2], index: 7, kind: output, shape index: {1}]  }
   0x1   :  { %2447 = sst [smem:[#allocation14_spill]] %s2436_s0 }
   0x2   :  { %13 = vsyncpa [#allocation5], 0 }
   0x3   :  { %14 = vsyncpa [#allocation3], 0 }
   0x4   :  { %15 = vsyncpa [#allocation8], 0 }
   0x5   :  { %17 = vsyncpa [#allocation8 + $0x1], 0 }
   0x6   :  { %18 = vsyncpa [#allocation4], 0 }
   0x7   :  { %20 = vsyncpa [#allocation4 + $0x1], 0  ;;  %s2131_s24 = smov 0   ;;  %s2133_s25 = smov 0  }
   0x8   :  { %s2135_s26 = smov 0   ;;  %s2137_s27 = smov 0  }
   0x9 LB: > { %s2152_s28 = sadd.s32 4294967295, %s2074_s27   ;;  %s1536_s29 = sadd.s32 4294967294, %s2074_s27   ;;  %s2074_s27 = sphi %s2137_s27, %s2467_s27   ;;  %s2070_s26 = sphi %s2135_s26, %s2466_s26   ;;  %s2066_s25 = sphi %s2133_s25, %s2465_s25   ;;  %s2062_s24 = sphi %s2131_s24, %s2464_s24  }
   0xa   : > { %p156_p0 = scmp.ne.s32.totalorder %s2066_s25, %s2062_s24  ;;  %p2444_p1 = scmp.eq.s32.totalorder %s2152_s28, 0 }
   0xb   : > { %p186_p3 = scmp.eq.s32.totalorder %s1536_s29, 1  ;;  %p1537_p5 = scmp.ge.s32.totalorder %s2074_s27, 1 }
   0xc   : > { %p2161_p4 = por %p2444_p1, %p156_p0  ;;  %p219_p7 = scmp.lt.s32.totalorder %s2074_s27, 3 }
   0xd   : > { %p2166_p6 = por %p186_p3, %p156_p0  ;;  %s2076_s10 = smov [#allocation6]  }
   0xe   : > { %s2448_s30 = scalar_select %p2161_p4, 1, 0 }
   0xf   : > { %s2449_s8 = scalar_select %p2166_p6, 1, 0 }
  0x10   : > { %p2171_p8 = pnand %p1537_p5, %p219_p7  ;;  %s246_s11 = sshll.u32 %s2076_s10, 4  ;;  %s2178_s11 = int_to_ptr.vmem [resolvable:$true] %s246_s11 }
  0x11   : > { %s2187_s13 = sadd.s32 1, %s2074_s27   ;;  %s2452_s0 = sld [smem:[#allocation14_spill]] }
  0x12   : > { %p1682_p10 = pneg %p2171_p8  ;;  %s140_s14 = ssub.s32 %s2074_s27, %s2187_s13 }
  0x14   : > { %p2182_p11 = pnand %p1682_p10, %p2444_p1 }
  0x16   : > { %p1931_p13 = pneg %p2182_p11 }
  0x17   : > { %s1929_s17 = scalar_lea.hbm %s2452_s0, 16 }
  0x18   : > { %p1930_p12 = scmp.ne.s32.totalorder %s2452_s0, %s1929_s17  ;;  %p1936_p5 = scmp.lt.u32.totalorder %s1929_s17, %s2452_s0 }
  0x1a   : > { %p1932_p0 = pnand %p1931_p13, %p1930_p12 }
  0x1c   : > { %p1933_p3 = pneg %p1932_p0 }
  0x1e   : > { %p1938_p7 = pnand %p1936_p5, %p1933_p3 }
  0x20   : > { %1941 = shalt.err (!%p1938_p7)
}
  0x21   : > { %s2077_s22 = smov [#allocation2]   ;;  %s1942_s16 = scalar_lea.hbm %s2440_s4, 12544 }
  0x22   : > { %1685 = dma.hbm_to_smem (!%p2182_p11), %s2452_s0, 16, %s2077_s22, [#allocation5]  }
  0x23   : > { %p1943_p10 = scmp.ne.s32.totalorder %s2440_s4, %s1942_s16  ;;  %p1949_p3 = scmp.lt.u32.totalorder %s1942_s16, %s2440_s4 }
  0x25   : > { %p1945_p12 = pnand %p1943_p10, %p1931_p13 }
  0x27   : > { %p1946_p0 = pneg %p1945_p12 }
  0x29   : > { %p1951_p5 = pnand %p1949_p3, %p1946_p0 }
  0x2b   : > { %1954 = shalt.err (!%p1951_p5)
}
  0x2c   : > { %s1955_s21 = scalar_lea.vmem %s2178_s11, 12544  ;;  %p1963_p2 = scmp.lt.s32.totalorder %s2178_s11, %s2178_s11 }
  0x2d   : > { %p1956_p7 = scmp.ne.s32.totalorder %s2178_s11, %s1955_s21  ;;  %p1964_p10 = scmp.lt.s32.totalorder %s1955_s21, %s1955_s21 }
  0x2f   : > { %p1958_p9 = pnand %p1956_p7, %p1931_p13  ;;  %p1965_p12 = por %p1964_p10, %p1963_p2 }
  0x31   : > { %p1959_p1 = pneg %p1958_p9 }
  0x33   : > { %p1966_p6 = pnand %p1965_p12, %p1959_p1 }
  0x35   : > { %1969 = shalt.err (!%p1966_p6)
}
  0x36   : > { %s2078_s22 = smov 448   ;;  %s2079_s23 = smov 28  }
  0x37   : > { %1688 = dma.hbm_to_vmem [thread:$0]  (!%p2182_p11), %s2440_s4, 12544, %s2178_s11, [#allocation3], %s2078_s22, %s2078_s22, %s2079_s23  }
  0x38   : > { %p141_p1 = scmp.eq.s32.totalorder %s140_s14, 0  ;;  %s143_s15 = sadd.s32 1, %s2070_s26 }
  0x39   : > { %p150_p2 = scmp.ne.s32.totalorder %s2070_s26, %s2066_s25  ;;  %p151_p6 = scmp.eq.s32.totalorder %s2074_s27, 0 }
  0x3a   : > { %s2243_s16 = scalar_select %p141_p1, %s2070_s26, %s143_s15  }
  0x3b   : > { %p152_p9 = por %p151_p6, %p150_p2  ;;  %p2453_p13 = scmp.eq.s32.totalorder %s2152_s28, 1 }
  0x3c   : > { %p1699_p3 = scmp.lt.s32.totalorder %s2074_s27, 2  ;;  %s268_s19 = sand.u32 1, %s2070_s26  }
  0x3d   : > { %p2247_p0 = por %p2453_p13, %p150_p2  ;;  %s1664_s12 = smul.u32 56, %s268_s19 }
  0x3e   : > { %s1665_s17 = smul.u32 896, %s2074_s27  ;;  %p2254_p5 = pnand %p1699_p3, %p152_p9 }
  0x3f   : > { %s2454_s18 = scalar_select %p2247_p0, 1, 0 }
  0x40   : > { %s2261_s21 = scalar_lea.hbm %s2441_s5, %s1665_s17  ;;  %s272_s22 = scalar_lea.vmem [#allocation7], %s1664_s12 }
  0x41   : > { %s280_s23 = sshll.u32 %s272_s22, 4  ;;  %s269_s29 = scalar_lea.sflag [#allocation8], %s268_s19  ;;  %s2263_s23 = int_to_ptr.vmem [resolvable:$true] %s280_s23 }
  0x42   : > { %s1970_s10 = scalar_lea.hbm %s2261_s21, 896  ;;  %p1972_p7 = pneg %p2254_p5 }
  0x43   : > { %p1971_p11 = scmp.ne.s32.totalorder %s2261_s21, %s1970_s10  ;;  %s1975_s11 = scalar_lea.hbm %s2441_s5, 1792 }
  0x44   : > { %p1976_p1 = scmp.lt.u32.totalorder %s2261_s21, %s2441_s5  ;;  %p1977_p2 = scmp.lt.u32.totalorder %s1975_s11, %s1970_s10 }
  0x45   : > { %p1973_p10 = pnand %p1972_p7, %p1971_p11  ;;  %p1979_p9 = scmp.lt.u32.totalorder %s1970_s10, %s2261_s21 }
  0x46   : > { %p1978_p6 = por %p1977_p2, %p1976_p1 }
  0x47   : > { %p1974_p12 = pneg %p1973_p10 }
  0x48   : > { %p1980_p13 = por %p1979_p9, %p1978_p6 }
  0x4a   : > { %p1981_p3 = pnand %p1980_p13, %p1974_p12 }
  0x4c   : > { %1984 = shalt.err (!%p1981_p3)
}
  0x4d   : > { %s1985_s19 = scalar_lea.vmem %s2263_s23, 896  ;;  %s2080_s12 = smov [#allocation7]  }
  0x4e   : > { %p1986_p11 = scmp.ne.s32.totalorder %s2263_s23, %s1985_s19  ;;  %s1990_s22 = sshll.u32 %s2080_s12, 4  ;;  %s1991_s22 = int_to_ptr.vmem [resolvable:$false] %s1990_s22 }
  0x4f   : > { %s1992_s0 = scalar_lea.vmem %s1991_s22, 1792  ;;  %p1993_p4 = scmp.lt.s32.totalorder %s2263_s23, %s1991_s22 }
  0x50   : > { %p1988_p10 = pnand %p1986_p11, %p1972_p7  ;;  %p1994_p1 = scmp.lt.s32.totalorder %s1992_s0, %s1985_s19 }
  0x52   : > { %p1989_p0 = pneg %p1988_p10  ;;  %p1995_p2 = por %p1994_p1, %p1993_p4 }
  0x54   : > { %p1996_p6 = pnand %p1995_p2, %p1989_p0 }
  0x56   : > { %1999 = shalt.err (!%p1996_p6)
}
  0x57   : > { %1692 = dma.hbm_to_vmem [thread:$0]  (!%p2254_p5), %s2261_s21, 896, %s2263_s23, %s269_s29  }
  0x58   : > { %289 = sbr.rel (%p2171_p8) target bundleno = 902 (0x386), region = 44  ;;  %p2456_p7 = scmp.eq.s32.totalorder (!%p2171_p8), %s2152_s28, 0 }
  0x5f   : > { %2045 = dma.done.wait (%p2456_p7), [#allocation5], 16   ;;  %p2457_p12 = pmov %p2456_p7 }
  0x60   : > { %p2458_p9 = pmov %p2456_p7 }
  0x61   : > { %2047 = vsyncadd (%p2457_p12), [#allocation5], 4294967280 }
  0x62   : > { %2049 = dma.done.wait (%p2458_p9), [#allocation3], 12544   ;;  %p2459_p4 = pmov %p2456_p7 }
  0x63   : > { %s2301_s20 = sand.u32 1, %s2066_s25   ;;  %p2460_p8 = scmp.ne.s32.totalorder %s2448_s30, 0 }
  0x64   : > { %2051 = vsyncadd (%p2459_p4), [#allocation3], 4294954752  ;;  %s1666_s9 = smul.u32 56, %s2301_s20  ;;  %s300_s21 = scalar_lea.sflag [#allocation8], %s2301_s20 }
  0x66   : > { %s2305_s23 = scalar_lea.vmem [#allocation7], %s1666_s9 }
  0x67   : > { %2053 = dma.done.wait (%p2460_p8), %s300_s21, 896  }
  0x68   : > { %2055 = vsyncadd (%p2460_p8), %s300_s21, 4294966400 }
  0x69   : > { %308 = sfence }
  0x6a   : > { %p344_p0 = scmp.lt.s32.totalorder %s2152_s28, 1  ;;  %s2081_s30 = smov 112   ;;  %v2087_v9 = vmov 0   ;;  %v1789_v10 = vld [vmem:[#allocation6 + $0x4] ss:$28 sps:$4 sm:$0xff]   ;;  %vm367_vm0 = vcmask 1039360  }
  0x6b   : > { %s2082_s14 = smov 127   ;;  %s2083_s19 = smov 95   ;;  %494 = vmatprep.mubr.bf16.mxu0 %v2087_v9  ;;  %1788 = vset.pattern.permute.xlu0 %v2087_v9  ;;  %v1794_v11 = vld [vmem:[#allocation6] ss:$28 sps:$4 sm:$0xff]   ;;  %v1800_v13 = vld [vmem:[#allocation6 + $0x38] ss:$28 sps:$4 sm:$0xff]  }
  0x6c   : > { %s2313_s29 = scalar_select %p344_p0, %s2152_s28, 1  ;;  %v1795_v12 = vld [vmem:[#allocation6 + $0x3c] ss:$28 sps:$4 sm:$0xff]   ;;  %1135 = vmatprep.subr.bf16.mxu1 %v1789_v10  ;;  %v506_v14 = vld [vmem:[%s2439_s3] sm:$0xff]  ;;  %v1801_v15 = vld [vmem:[#allocation6 + $0x74] ss:$28 sps:$4 sm:$0xff]  }
  0x6d   : > { %s2084_s12 = smov 126   ;;  %s2085_s22 = smov 110   ;;  %1136 = vmatpush1.bf16.msra.mxu1 %v1794_v11  ;;  %v1806_v16 = vld [vmem:[#allocation6 + $0x70] ss:$28 sps:$4 sm:$0xff]   ;;  %v1812_v18 = vld [vmem:[#allocation6 + $0xa8] ss:$28 sps:$4 sm:$0xff]  }
  0x6e   : > { %s1668_s10 = smul.u32 6, %s2313_s29  ;;  %s2086_s0 = smov 111   ;;  %1137 = vmatprep.subr.bf16.mxu1 %v1795_v12  ;;  %v1807_v17 = vld [vmem:[#allocation6 + $0xac] ss:$28 sps:$4 sm:$0xff]   ;;  %v1813_v19 = vld [vmem:[#allocation6 + $0xe4] ss:$28 sps:$4 sm:$0xff]  }
  0x6f   : > { %s2088_s9 = smov 96   ;;  %s2089_s21 = smov 94   ;;  %v1818_v20 = vld [vmem:[#allocation6 + $0xe0] ss:$28 sps:$4 sm:$0xff]   ;;  %v1824_v22 = vld [vmem:[#allocation6 + $0x118] ss:$28 sps:$4 sm:$0xff]  }
  0x70   : > { %s348_s11 = scalar_lea.vmem %s2437_s1, %s1668_s10  ;;  %v1819_v21 = vld [vmem:[#allocation6 + $0x11c] ss:$28 sps:$4 sm:$0xff]   ;;  %v1825_v23 = vld [vmem:[#allocation6 + $0x154] ss:$28 sps:$4 sm:$0xff]   ;;  %v1831_v25 = vld [vmem:[#allocation6 + $0x18c] ss:$28 sps:$4 sm:$0xff]  }
  0x71   : > { %v356_v0 = vld [vmem:[%s348_s11] sm:$0x3f]  ;;  %1138 = vmatpush1.bf16.msra.mxu1 %v1800_v13  ;;  %v1830_v24 = vld [vmem:[#allocation6 + $0x150] ss:$28 sps:$4 sm:$0xff]   ;;  %v1843_v29 = vld [vmem:[#allocation6 + $0x1fc] ss:$28 sps:$4 sm:$0xff]  }
  0x72   : > { %v2319_v1 = vunpack.c.l.bf16 %v356_v0  ;;  %v358_v2 = vunpack.c.h.bf16 %v356_v0  ;;  %1139 = vmatprep.subr.bf16.mxu1 %v1801_v15  ;;  %v1836_v26 = vld [vmem:[#allocation6 + $0x188] ss:$28 sps:$4 sm:$0xff]   ;;  %v1842_v28 = vld [vmem:[#allocation6 + $0x1c0] ss:$28 sps:$4 sm:$0xff]   ;;  %v1848_v30 = vld [vmem:[#allocation6 + $0x1f8] ss:$28 sps:$4 sm:$0xff]  }
  0x73   : > { %v1837_v27 = vld [vmem:[#allocation6 + $0x1c4] ss:$28 sps:$4 sm:$0xff]   ;;  %v1849_v31 = vld [vmem:[#allocation6 + $0x234] ss:$28 sps:$4 sm:$0xff]   ;;  %v1855_v33 = vld [vmem:[#allocation6 + $0x26c] ss:$28 sps:$4 sm:$0xff]  }
  0x74   : > { %v362_v3 = vcombine.low %v2319_v1, %v2319_v1  ;;  %v412_v4 = vcombine.low %v358_v2, %v358_v2  ;;  %v2325_v5 = vcombine.high %v2319_v1, %v2319_v1  ;;  %v1854_v32 = vld [vmem:[#allocation6 + $0x230] ss:$28 sps:$4 sm:$0xff]   ;;  %v1860_v34 = vld [vmem:[#allocation6 + $0x268] ss:$28 sps:$4 sm:$0xff]   ;;  %vm435_vm1 = vcmask 1043456   ;;  %s1385_s10 = scalar_lea.sflag [#allocation4], %s2301_s20 }
  0x75   : > { %1140 = vmatpush1.bf16.msra.mxu1 %v1806_v16  ;;  %vm375_vm2 = vcmask 1031168   ;;  %vm383_vm3 = vcmask 916480   ;;  %vm399_vm4 = vcmask 900096   ;;  %vm391_vm5 = vcmask 908288   ;;  %p2461_p13 = scmp.ne.s32.totalorder %s2454_s18, 0  ;;  %s2090_s17 = smov [#allocation9]  }
  0x76   : > { %v1758_v6 = vpack.i.bf16 %v2319_v1, %v362_v3  ;;  %v1763_v7 = vpack.i.bf16 %v412_v4, %v2319_v1  ;;  %v1753_v8 = vpack.i.bf16 %v2325_v5, %v2319_v1  ;;  %1141 = vmatprep.subr.bf16.mxu1 %v1807_v17  ;;  %vm419_vm6 = vcmask 777216   ;;  %s2004_s11 = sshll.u32 %s2090_s17, 4  ;;  %s2005_s11 = int_to_ptr.vmem [resolvable:$false] %s2004_s11 }
  0x77   : > { %vm407_vm7 = vcmask 785408   ;;  %vm430_vm8 = vcmask 769024   ;;  %vm455_vm9 = vcmask 1041408   ;;  %vm451_vm10 = vcmask 293888  }
  0x78   : > { %1759 = vrot.lane.b32.xlu1 %v1758_v6, %s2081_s30  ;;  %1749 = vrot.lane.b32.xlu0 %v1758_v6, %s2082_s14  ;;  %s1547_s30 = sld [smem:[#allocation2 + $0x1]]  ;;  %s1548_s14 = sld [smem:[#allocation2 + $0x3]]  ;;  %vm1352_vm11 = vcmask 125952   ;;  %vm1359_vm12 = vcmask 130048  }
  0x79   : > { %1142 = vmatpush1.bf16.msra.mxu1 %v1812_v18 }
  0x7a   : > { %1143 = vmatprep.subr.bf16.mxu1 %v1813_v19 }
  0x7c   : > { %1764 = vrot.lane.b32.xlu1 %v1763_v7, %s2083_s19  ;;  %1754 = vrot.lane.b32.xlu0 %v1753_v8, %s2084_s12 }
  0x7d   : > { %1144 = vmatpush1.bf16.msra.mxu1 %v1818_v20 }
  0x7e   : > { %1145 = vmatprep.subr.bf16.mxu1 %v1819_v21 }
  0x80   : > { %1774 = vrot.lane.b32.xlu1 %v1758_v6, %s2085_s22  ;;  %1769 = vrot.lane.b32.xlu0 %v1753_v8, %s2086_s0 }
  0x81   : > { %1146 = vmatpush1.bf16.msra.mxu1 %v1824_v22  ;;  %v1793_v22 = vld [vmem:[#allocation6 + $0xc] ss:$28 sps:$4 sm:$0xff]  }
  0x82   : > { %1147 = vmatprep.subr.bf16.mxu1 %v1825_v23 }
  0x84   : > { %413 = vrot.lane.b32.xlu1 %v362_v3, %s2083_s19  ;;  %1779 = vrot.lane.b32.xlu0 %v1753_v8, %s2088_s9  ;;  %s1667_s19 = smul.u32 28, %s2301_s20 }
  0x85   : > { %1148 = vmatpush1.bf16.msra.mxu1 %v1830_v24  ;;  %v450_v24 = vld [vmem:[%s2438_s2] sm:$0xf] }
  0x86   : > { %1149 = vmatprep.subr.bf16.mxu1 %v1831_v25  ;;  %v1791_v25 = vld [vmem:[#allocation6 + $0x8] ss:$28 sps:$4 sm:$0xff]   ;;  %s2380_s12 = scalar_lea.vmem [#allocation9], %s1667_s19 }
  0x87   : > { %s1403_s22 = sshll.u32 %s2380_s12, 4  ;;  %s1404_s22 = int_to_ptr.vmem [resolvable:$true] %s1403_s22 }
  0x88   : > { %1784 = vrot.lane.b32.xlu0 %v1753_v8, %s2089_s21  ;;  %428 = vrot.lane.b32.xlu1 %v358_v2, %s2089_s21  ;;  %s2000_s15 = scalar_lea.vmem %s1404_s22, 448  ;;  %p2007_p10 = scmp.lt.s32.totalorder %s1404_s22, %s2005_s11 }
  0x89   : > { %1150 = vmatpush1.bf16.msra.mxu1 %v1836_v26  ;;  %v1799_v26 = vld [vmem:[#allocation6 + $0x44] ss:$28 sps:$4 sm:$0xff]   ;;  %p2001_p5 = scmp.ne.s32.totalorder %s1404_s22, %s2000_s15 }
  0x8a   : > { %1151 = vmatprep.subr.bf16.mxu1 %v1837_v27  ;;  %v1797_v27 = vld [vmem:[#allocation6 + $0x40] ss:$28 sps:$4 sm:$0xff]  }
  0x8b   : > { %p2002_p3 = pnand %p2001_p5, %p2461_p13 }
  0x8c   : > { %509 = vperm.xlu0 %1788, %v506_v14  }
  0x8d   : > { %1152 = vmatpush1.bf16.msra.mxu1 %v1842_v28  ;;  %v1805_v28 = vld [vmem:[#allocation6 + $0x7c] ss:$28 sps:$4 sm:$0xff]   ;;  %p2003_p11 = pneg %p2002_p3 }
  0x8e   : > { %1153 = vmatprep.subr.bf16.mxu1 %v1843_v29  ;;  %v1803_v29 = vld [vmem:[#allocation6 + $0x78] ss:$28 sps:$4 sm:$0xff]  }
  0x91   : > { %1154 = vmatpush1.bf16.msra.mxu1 %v1848_v30  ;;  %v1811_v30 = vld [vmem:[#allocation6 + $0xb4] ss:$28 sps:$4 sm:$0xff]  }
  0x92   : > { %1155 = vmatprep.subr.bf16.mxu1 %v1849_v31  ;;  %v1809_v31 = vld [vmem:[#allocation6 + $0xb0] ss:$28 sps:$4 sm:$0xff]  }
  0x95   : > { %1156 = vmatpush1.bf16.msra.mxu1 %v1854_v32  ;;  %v1817_v32 = vld [vmem:[#allocation6 + $0xec] ss:$28 sps:$4 sm:$0xff]  }
  0x96   : > { %1157 = vmatprep.subr.bf16.mxu1 %v1855_v33  ;;  %v1815_v33 = vld [vmem:[#allocation6 + $0xe8] ss:$28 sps:$4 sm:$0xff]  }
  0x99   : > { %1158 = vmatpush1.bf16.msra.mxu1 %v1860_v34  ;;  %v1823_v34 = vld [vmem:[#allocation6 + $0x124] ss:$28 sps:$4 sm:$0xff]  }
  0xea   : > { %v1760_v35 = vpop.permute.xlu1 %1759  ;;  %v1750_v36 = vpop.permute.xlu0 %1749 }
  0xeb   : > { %v1752_v37 = vunpack.i.h.bf16 %v1750_v36  ;;  %v1751_v38 = vunpack.i.l.bf16 %v1750_v36  ;;  %v1762_v39 = vunpack.i.h.bf16 %v1760_v35  ;;  %v1761_v40 = vunpack.i.l.bf16 %v1760_v35  ;;  %v1821_v35 = vld [vmem:[#allocation6 + $0x120] ss:$28 sps:$4 sm:$0xff]  }
  0xec   : > { %v1829_v36 = vld [vmem:[#allocation6 + $0x15c] ss:$28 sps:$4 sm:$0xff]  }
  0xed   : > { %v368_v45 = vsel %vm367_vm0, %v1751_v38, %v1752_v37  ;;  %v437_v46 = vsel %vm435_vm1, %v2325_v5, %v1752_v37  ;;  %v384_v49 = vsel %vm383_vm3, %v1761_v40, %v1762_v39  ;;  %v1827_v37 = vld [vmem:[#allocation6 + $0x158] ss:$28 sps:$4 sm:$0xff]   ;;  %v1841_v40 = vld [vmem:[#allocation6 + $0x1cc] ss:$28 sps:$4 sm:$0xff]  }
  0xee   : > { %v1765_v41 = vpop.permute.xlu1 %1764  ;;  %v1755_v42 = vpop.permute.xlu0 %1754  ;;  %v436_v53 = vsel %vm435_vm1, %v2319_v1, %v368_v45  ;;  %v1835_v38 = vld [vmem:[#allocation6 + $0x194] ss:$28 sps:$4 sm:$0xff]  }
  0xef   : > { %v1757_v43 = vunpack.i.h.bf16 %v1755_v42  ;;  %v1756_v44 = vunpack.i.l.bf16 %v1755_v42  ;;  %v1767_v59 = vunpack.i.h.bf16 %v1765_v41  ;;  %v1766_v60 = vunpack.i.l.bf16 %v1765_v41  ;;  %v1839_v41 = vld [vmem:[#allocation6 + $0x1c8] ss:$28 sps:$4 sm:$0xff]   ;;  %v1851_v45 = vld [vmem:[#allocation6 + $0x238] ss:$28 sps:$4 sm:$0xff]  }
  0xf0   : > { %v1847_v42 = vld [vmem:[#allocation6 + $0x204] ss:$28 sps:$4 sm:$0xff]  }
  0xf1   : > { %v439_v47 = vsel %vm435_vm1, %v1757_v43, %v1762_v39  ;;  %v376_v48 = vsel %vm375_vm2, %v1756_v44, %v1757_v43  ;;  %v421_v4 = vsel %vm419_vm6, %v1766_v60, %v1767_v59  ;;  %v1833_v39 = vld [vmem:[#allocation6 + $0x190] ss:$28 sps:$4 sm:$0xff]   ;;  %v1845_v43 = vld [vmem:[#allocation6 + $0x200] ss:$28 sps:$4 sm:$0xff]  }
  0xf2   : > { %v1775_v50 = vpop.permute.xlu1 %1774  ;;  %v1770_v51 = vpop.permute.xlu0 %1769  ;;  %v445_v52 = vpack.c.bf16 %v439_v47, %v437_v46  ;;  %v438_v54 = vsel %vm435_vm1, %v376_v48, %v384_v49  ;;  %v1853_v44 = vld [vmem:[#allocation6 + $0x23c] ss:$28 sps:$4 sm:$0xff]   ;;  %v1859_v46 = vld [vmem:[#allocation6 + $0x274] ss:$28 sps:$4 sm:$0xff]   ;;  %v1861_v48 = vld [vmem:[#allocation6 + $0x2a4] ss:$28 sps:$4 sm:$0xff]  }
  0xf3   : > { %v1777_v55 = vunpack.i.h.bf16 %v1775_v50  ;;  %v1776_v56 = vunpack.i.l.bf16 %v1775_v50  ;;  %v1772_v57 = vunpack.i.h.bf16 %v1770_v51  ;;  %v1771_v58 = vunpack.i.l.bf16 %v1770_v51  ;;  %v1857_v47 = vld [vmem:[#allocation6 + $0x270] ss:$28 sps:$4 sm:$0xff]   ;;  %v1863_v50 = vld [vmem:[#allocation6 + $0x2a8] ss:$28 sps:$4 sm:$0xff]   ;;  %v1866_v51 = vld [vmem:[#allocation6 + $0x2a0] ss:$28 sps:$4 sm:$0xff]   ;;  %1159 = vmatprep.subr.bf16.mxu1 %v1861_v48 }
  0xf4   : > { %462 = vmatprep.subr.bf16.mxu0 %v445_v52  ;;  %v444_v61 = vpack.c.bf16 %v438_v54, %v436_v53  ;;  %v1865_v49 = vld [vmem:[#allocation6 + $0x2ac] ss:$28 sps:$4 sm:$0xff]   ;;  %1160 = vmatpush1.bf16.msra.mxu1 %v1866_v51  ;;  %v1867_v52 = vld [vmem:[#allocation6 + $0x2dc] ss:$28 sps:$4 sm:$0xff]   ;;  %v1871_v53 = vld [vmem:[#allocation6 + $0x2e4] ss:$28 sps:$4 sm:$0xff]   ;;  %v1305_v48 = vstv %s1548_s14 }
  0xf5   : > { %v400_v0 = vsel %vm399_vm4, %v1776_v56, %v1777_v55  ;;  %v392_v2 = vsel %vm391_vm5, %v1771_v58, %v1772_v57  ;;  %v441_v7 = vsel %vm435_vm1, %v1772_v57, %v1777_v55  ;;  %v1869_v54 = vld [vmem:[#allocation6 + $0x2e0] ss:$28 sps:$4 sm:$0xff]   ;;  %v1872_v55 = vld [vmem:[#allocation6 + $0x2d8] ss:$28 sps:$4 sm:$0xff]   ;;  %1161 = vmatprep.subr.bf16.mxu1 %v1867_v52  ;;  %v503_v57 = vstv %s1547_s30  ;;  %s2006_s30 = scalar_lea.vmem %s2005_s11, 896 }
  0xf6   : > { %463 = vmatpush1.bf16.msra.mxu0 %v444_v61  ;;  %v414_v62 = vpop.permute.xlu1 %413  ;;  %v1780_v63 = vpop.permute.xlu0 %1779  ;;  %v440_v13 = vsel %vm435_vm1, %v392_v2, %v400_v0  ;;  %v1875_v56 = vld [vmem:[#allocation6 + $0x14] ss:$28 sps:$4 sm:$0xff]   ;;  %v1301_v51 = vld [vmem:[%s2305_s23 + $0x18] sm:$0xff]  ;;  %p2008_p1 = scmp.lt.s32.totalorder %s2006_s30, %s2000_s15 }
  0xf7   : > { %v1782_v1 = vunpack.i.h.bf16 %v1780_v63  ;;  %v1781_v3 = vunpack.i.l.bf16 %v1780_v63  ;;  %v420_v5 = vsel %vm419_vm6, %v414_v62, %v1766_v60 }
  0xf8   : > { %1162 = vmatpush1.bf16.msra.mxu1 %v1872_v55  ;;  %v1309_v55 = vmul.f32 %v1305_v48, %v1301_v51  ;;  %p2009_p2 = por %p2008_p1, %p2007_p10 }
  0xf9   : > { %v408_v6 = vsel %vm407_vm7, %v1781_v3, %v1782_v1  ;;  %v443_v8 = vsel %vm435_vm1, %v1782_v1, %v421_v4  ;;  %1217 = vmatprep.subr.bf16.mxu1 %v1875_v56  ;;  %v1873_v4 = vld [vmem:[#allocation6 + $0x10] ss:$28 sps:$4 sm:$0xff]  }
  0xfa   : > { %v1785_v10 = vpop.permute.xlu0 %1784  ;;  %v429_v11 = vpop.permute.xlu1 %428  ;;  %v447_v12 = vpack.c.bf16 %v443_v8, %v441_v7  ;;  %v442_v14 = vsel %vm435_vm1, %v408_v6, %v420_v5  ;;  %v1876_v5 = vld [vmem:[#allocation6 + $0x18] ss:$28 sps:$4 sm:$0xff]   ;;  %v1879_v7 = vld [vmem:[#allocation6 + $0x4c] ss:$28 sps:$4 sm:$0xff]   ;;  %p2010_p6 = pnand %p2009_p2, %p2003_p11 }
  0xfb   : > { %v1787_v15 = vunpack.i.h.bf16 %v1785_v10  ;;  %v1786_v16 = vunpack.i.l.bf16 %v1785_v10  ;;  %v446_v17 = vpack.c.bf16 %v442_v14, %v440_v13  ;;  %v1877_v8 = vld [vmem:[#allocation6 + $0x48] ss:$28 sps:$4 sm:$0xff]   ;;  %v1880_v10 = vld [vmem:[#allocation6 + $0x50] ss:$28 sps:$4 sm:$0xff]   ;;  %v1887_v14 = vld [vmem:[#allocation6 + $0xbc] ss:$28 sps:$4 sm:$0xff]  }
  0xfc   : > { %464 = vmatprep.subr.bf16.mxu0 %v447_v12  ;;  %v1881_v12 = vld [vmem:[#allocation6 + $0x80] ss:$28 sps:$4 sm:$0xff]   ;;  %v1884_v13 = vld [vmem:[#allocation6 + $0x88] ss:$28 sps:$4 sm:$0xff]  }
  0xfd   : > { %v432_v18 = vsel %vm430_vm8, %v1787_v15, %v429_v11  ;;  %465 = vmatpush1.bf16.msra.mxu0 %v446_v17  ;;  %v431_v19 = vsel %vm430_vm8, %v1786_v16, %v1787_v15  ;;  %v1883_v11 = vld [vmem:[#allocation6 + $0x84] ss:$28 sps:$4 sm:$0xff]   ;;  %v1885_v15 = vld [vmem:[#allocation6 + $0xb8] ss:$28 sps:$4 sm:$0xff]  }
  0xfe   : > { %v449_v20 = vpack.c.bf16 %v432_v18, %v432_v18  ;;  %v448_v21 = vpack.c.bf16 %v431_v19, %v431_v19  ;;  %v1888_v16 = vld [vmem:[#allocation6 + $0xc0] ss:$28 sps:$4 sm:$0xff]   ;;  %v1891_v17 = vld [vmem:[#allocation6 + $0xf4] ss:$28 sps:$4 sm:$0xff]  }
  0xff   : > { %v1889_v18 = vld [vmem:[#allocation6 + $0xf0] ss:$28 sps:$4 sm:$0xff]   ;;  %v1892_v19 = vld [vmem:[#allocation6 + $0xf8] ss:$28 sps:$4 sm:$0xff]  }
 0x100   : > { %1549 = vmatprep.subr.msk.bf16.mxu0 %vm455_vm9, %v449_v20  ;;  %v457_v23 = vsel %vm455_vm9, %v448_v21, 0  ;;  %v1895_v20 = vld [vmem:[#allocation6 + $0x12c] ss:$28 sps:$4 sm:$0xff]  }
 0x101   : > { %467 = vmatpush1.bf16.msra.mxu0 %v457_v23  ;;  %v1893_v21 = vld [vmem:[#allocation6 + $0x128] ss:$28 sps:$4 sm:$0xff]  }
 0x102   : > { %1176 = vmatprep.subr.bf16.mxu0 %v1793_v22  ;;  %v1896_v22 = vld [vmem:[#allocation6 + $0x130] ss:$28 sps:$4 sm:$0xff]   ;;  %v1899_v23 = vld [vmem:[#allocation6 + $0x164] ss:$28 sps:$4 sm:$0xff]  }
 0x104   : > { %1550 = vmatmul.mubr.msk.bf16.vlgmr.msra.gmra.mrb[0].mxu0 %vm451_vm10, %v450_v24  ;;  %v1897_v24 = vld [vmem:[#allocation6 + $0x160] ss:$28 sps:$4 sm:$0xff]  }
 0x105   : > { %1177 = vmatpush1.bf16.msra.mxu0 %v1791_v25  ;;  %v1900_v25 = vld [vmem:[#allocation6 + $0x168] ss:$28 sps:$4 sm:$0xff]  }
 0x106   : > { %1178 = vmatprep.subr.bf16.mxu0 %v1799_v26  ;;  %v1903_v26 = vld [vmem:[#allocation6 + $0x19c] ss:$28 sps:$4 sm:$0xff]  }
 0x109   : > { %1179 = vmatpush1.bf16.msra.mxu0 %v1797_v27  ;;  %v1901_v27 = vld [vmem:[#allocation6 + $0x198] ss:$28 sps:$4 sm:$0xff]  }
 0x10a   : > { %1180 = vmatprep.subr.bf16.mxu0 %v1805_v28  ;;  %v1904_v28 = vld [vmem:[#allocation6 + $0x1a0] ss:$28 sps:$4 sm:$0xff]  }
 0x10b   : > { %v510_v59 = vpop.permute.xlu0 %509 }
 0x10d   : > { %1181 = vmatpush1.bf16.msra.mxu0 %v1803_v29  ;;  %v1907_v29 = vld [vmem:[#allocation6 + $0x1d4] ss:$28 sps:$4 sm:$0xff]  }
 0x10e   : > { %1182 = vmatprep.subr.bf16.mxu0 %v1811_v30  ;;  %v1905_v30 = vld [vmem:[#allocation6 + $0x1d0] ss:$28 sps:$4 sm:$0xff]  }
 0x111   : > { %1183 = vmatpush1.bf16.msra.mxu0 %v1809_v31  ;;  %v1908_v31 = vld [vmem:[#allocation6 + $0x1d8] ss:$28 sps:$4 sm:$0xff]  }
 0x112   : > { %1184 = vmatprep.subr.bf16.mxu0 %v1817_v32  ;;  %v1911_v32 = vld [vmem:[#allocation6 + $0x20c] ss:$28 sps:$4 sm:$0xff]  }
 0x115   : > { %1185 = vmatpush1.bf16.msra.mxu0 %v1815_v33  ;;  %v1909_v33 = vld [vmem:[#allocation6 + $0x208] ss:$28 sps:$4 sm:$0xff]  }
 0x116   : > { %1186 = vmatprep.subr.bf16.mxu0 %v1823_v34  ;;  %v1912_v34 = vld [vmem:[#allocation6 + $0x210] ss:$28 sps:$4 sm:$0xff]  }
 0x119   : > { %1187 = vmatpush1.bf16.msra.mxu0 %v1821_v35  ;;  %v1915_v35 = vld [vmem:[#allocation6 + $0x244] ss:$28 sps:$4 sm:$0xff]  }
 0x11a   : > { %1188 = vmatprep.subr.bf16.mxu0 %v1829_v36  ;;  %v1913_v36 = vld [vmem:[#allocation6 + $0x240] ss:$28 sps:$4 sm:$0xff]  }
 0x11d   : > { %1189 = vmatpush1.bf16.msra.mxu0 %v1827_v37  ;;  %v1916_v37 = vld [vmem:[#allocation6 + $0x248] ss:$28 sps:$4 sm:$0xff]  }
 0x11e   : > { %1190 = vmatprep.subr.bf16.mxu0 %v1835_v38  ;;  %v1919_v38 = vld [vmem:[#allocation6 + $0x27c] ss:$28 sps:$4 sm:$0xff]  }
 0x121   : > { %1191 = vmatpush1.bf16.msra.mxu0 %v1833_v39  ;;  %v1917_v39 = vld [vmem:[#allocation6 + $0x278] ss:$28 sps:$4 sm:$0xff]  }
 0x122   : > { %1192 = vmatprep.subr.bf16.mxu0 %v1841_v40  ;;  %v1920_v40 = vld [vmem:[#allocation6 + $0x280] ss:$28 sps:$4 sm:$0xff]  }
 0x125   : > { %1193 = vmatpush1.bf16.msra.mxu0 %v1839_v41  ;;  %v1923_v41 = vld [vmem:[#allocation6 + $0x2b4] ss:$28 sps:$4 sm:$0xff]  }
 0x126   : > { %1194 = vmatprep.subr.bf16.mxu0 %v1847_v42  ;;  %v1921_v42 = vld [vmem:[#allocation6 + $0x2b0] ss:$28 sps:$4 sm:$0xff]  }
 0x129   : > { %1195 = vmatpush1.bf16.msra.mxu0 %v1845_v43  ;;  %v1924_v43 = vld [vmem:[#allocation6 + $0x2b8] ss:$28 sps:$4 sm:$0xff]  }
 0x12a   : > { %1196 = vmatprep.subr.bf16.mxu0 %v1853_v44  ;;  %v1927_v44 = vld [vmem:[#allocation6 + $0x2ec] ss:$28 sps:$4 sm:$0xff]  }
 0x12d   : > { %1197 = vmatpush1.bf16.msra.mxu0 %v1851_v45  ;;  %v1925_v45 = vld [vmem:[#allocation6 + $0x2e8] ss:$28 sps:$4 sm:$0xff]  }
 0x12e   : > { %1198 = vmatprep.subr.bf16.mxu0 %v1859_v46  ;;  %v1928_v46 = vld [vmem:[#allocation6 + $0x2f0] ss:$28 sps:$4 sm:$0xff]  }
 0x131   : > { %1199 = vmatpush1.bf16.msra.mxu0 %v1857_v47  ;;  %v1298_v47 = vld [vmem:[%s2305_s23] sm:$0xff] }
 0x132   : > { %1200 = vmatprep.subr.bf16.mxu0 %v1865_v49  ;;  %v1300_v49 = vld [vmem:[%s2305_s23 + $0x10] sm:$0xff]  ;;  %v1306_v52 = vmul.f32 %v1305_v48, %v1298_v47 }
 0x135   : > { %1201 = vmatpush1.bf16.msra.mxu0 %v1863_v50  ;;  %v1299_v50 = vld [vmem:[%s2305_s23 + $0x8] sm:$0xff] }
 0x136   : > { %1202 = vmatprep.subr.bf16.mxu0 %v1871_v53  ;;  %v1308_v53 = vmul.f32 %v1305_v48, %v1300_v49 }
 0x139   : > { %1203 = vmatpush1.bf16.msra.mxu0 %v1869_v54  ;;  %v1307_v54 = vmul.f32 %v1305_v48, %v1299_v50 }
 0x13a   : > { %1258 = vmatprep.subr.bf16.mxu0 %v2087_v9 }
 0x1d7   : > { %v496_v58 = vpop.f32.mrb[0].mxu0 }
 0x1d8   : > { %v504_v60 = vmul.f32 %v503_v57, %v496_v58  ;;  %v498_v61 = vpop.f32.mrb[1].mxu0 }
 0x1d9   : > { %v505_v62 = vmul.f32 %v503_v57, %v498_v61  ;;  %v500_v63 = vpop.f32.mrb[2].mxu0 }
 0x1da   : > { %v512_v0 = vadd.f32 %v510_v59, %v504_v60  ;;  %v501_v2 = vpop.f32.mrb[3].mxu0 }
 0x1db   : > { %v513_v1 = vadd.f32 %v510_v59, %v505_v62 }
 0x1dc   : > { %v2352_v6 = vpack.c.bf16 %v512_v0, %v512_v0 }
 0x1dd   : > { %v515_v3 = vpack.c.bf16 %v513_v1, %v513_v1 }
 0x1df   : > { %1649 = vmatprep.mubr.msk.bf16.mxu1 %vm407_vm7, %v515_v3  ;;  %1650 = vmatprep.mubr.msk.bf16.mxu0 %vm407_vm7, %v515_v3 }
 0x1e0   : > { %1168 = vmatmul.mubr.bf16.vlgmr.msra.gmra.mrb[0].mxu1 %v2352_v6  ;;  %1209 = vmatmul.mubr.bf16.vlgmr.msra.gmra.mrb[4].mxu0 %v2352_v6 }
 0x1e1   : > { %1218 = vmatpush1.bf16.msra.mxu1 %v1873_v4  ;;  %1259 = vmatpush1.bf16.msra.mxu0 %v1876_v5 }
 0x1e2   : > { %1651 = vmatprep.mubr.msk.bf16.mxu1 %vm407_vm7, %v515_v3  ;;  %1652 = vmatprep.mubr.msk.bf16.mxu0 %vm407_vm7, %v515_v3 }
 0x1e3   : > { %1219 = vmatprep.subr.bf16.mxu1 %v1879_v7  ;;  %1260 = vmatprep.subr.bf16.mxu0 %v2087_v9 }
 0x1e5   : > { %1220 = vmatpush1.bf16.msra.mxu1 %v1877_v8  ;;  %1261 = vmatpush1.bf16.msra.mxu0 %v1880_v10 }
 0x1e6   : > { %1221 = vmatprep.subr.bf16.mxu1 %v1883_v11  ;;  %1262 = vmatprep.subr.bf16.mxu0 %v2087_v9 }
 0x1e9   : > { %1222 = vmatpush1.bf16.msra.mxu1 %v1881_v12  ;;  %1263 = vmatpush1.bf16.msra.mxu0 %v1884_v13 }
 0x1ea   : > { %1223 = vmatprep.subr.bf16.mxu1 %v1887_v14  ;;  %1264 = vmatprep.subr.bf16.mxu0 %v2087_v9 }
 0x1ed   : > { %1224 = vmatpush1.bf16.msra.mxu1 %v1885_v15  ;;  %1265 = vmatpush1.bf16.msra.mxu0 %v1888_v16  ;;  %v1302_v16 = vld [vmem:[%s2305_s23 + $0x20] sm:$0xff] }
 0x1ee   : > { %1225 = vmatprep.subr.bf16.mxu1 %v1891_v17  ;;  %1266 = vmatprep.subr.bf16.mxu0 %v2087_v9  ;;  %v1304_v17 = vld [vmem:[%s2305_s23 + $0x30] sm:$0xff] }
 0x1f1   : > { %1226 = vmatpush1.bf16.msra.mxu1 %v1889_v18  ;;  %1267 = vmatpush1.bf16.msra.mxu0 %v1892_v19  ;;  %v1303_v18 = vld [vmem:[%s2305_s23 + $0x28] sm:$0xff]  ;;  %v1310_v19 = vmul.f32 %v1305_v48, %v1302_v16  ;;  %s1669_s23 = smul.u32 448, %s2152_s28 }
 0x1f2   : > { %1227 = vmatprep.subr.bf16.mxu1 %v1895_v20  ;;  %1268 = vmatprep.subr.bf16.mxu0 %v2087_v9  ;;  %v1312_v20 = vmul.f32 %v1305_v48, %v1304_v17 }
 0x1f3   : > { %s2394_s21 = scalar_lea.hbm %s2442_s6, %s1669_s23 }
 0x1f5   : > { %1228 = vmatpush1.bf16.msra.mxu1 %v1893_v21  ;;  %1269 = vmatpush1.bf16.msra.mxu0 %v1896_v22  ;;  %v1311_v21 = vmul.f32 %v1305_v48, %v1303_v18 }
 0x1f6   : > { %1229 = vmatprep.subr.bf16.mxu1 %v1899_v23  ;;  %1270 = vmatprep.subr.bf16.mxu0 %v2087_v9 }
 0x1f9   : > { %1230 = vmatpush1.bf16.msra.mxu1 %v1897_v24  ;;  %1271 = vmatpush1.bf16.msra.mxu0 %v1900_v25 }
 0x1fa   : > { %1231 = vmatprep.subr.bf16.mxu1 %v1903_v26  ;;  %1272 = vmatprep.subr.bf16.mxu0 %v2087_v9 }
 0x1fd   : > { %1232 = vmatpush1.bf16.msra.mxu1 %v1901_v27  ;;  %1273 = vmatpush1.bf16.msra.mxu0 %v1904_v28 }
 0x1fe   : > { %1233 = vmatprep.subr.bf16.mxu1 %v1907_v29  ;;  %1274 = vmatprep.subr.bf16.mxu0 %v2087_v9 }
 0x201   : > { %1234 = vmatpush1.bf16.msra.mxu1 %v1905_v30  ;;  %1275 = vmatpush1.bf16.msra.mxu0 %v1908_v31 }
 0x202   : > { %1235 = vmatprep.subr.bf16.mxu1 %v1911_v32  ;;  %1276 = vmatprep.subr.bf16.mxu0 %v2087_v9 }
 0x205   : > { %1236 = vmatpush1.bf16.msra.mxu1 %v1909_v33  ;;  %1277 = vmatpush1.bf16.msra.mxu0 %v1912_v34 }
 0x206   : > { %1237 = vmatprep.subr.bf16.mxu1 %v1915_v35  ;;  %1278 = vmatprep.subr.bf16.mxu0 %v2087_v9 }
 0x209   : > { %1238 = vmatpush1.bf16.msra.mxu1 %v1913_v36  ;;  %1279 = vmatpush1.bf16.msra.mxu0 %v1916_v37 }
 0x20a   : > { %1239 = vmatprep.subr.bf16.mxu1 %v1919_v38  ;;  %1280 = vmatprep.subr.bf16.mxu0 %v2087_v9 }
 0x20d   : > { %1240 = vmatpush1.bf16.msra.mxu1 %v1917_v39  ;;  %1281 = vmatpush1.bf16.msra.mxu0 %v1920_v40 }
 0x20e   : > { %1241 = vmatprep.subr.bf16.mxu1 %v1923_v41  ;;  %1282 = vmatprep.subr.bf16.mxu0 %v2087_v9 }
 0x211   : > { %1242 = vmatpush1.bf16.msra.mxu1 %v1921_v42  ;;  %1283 = vmatpush1.bf16.msra.mxu0 %v1924_v43 }
 0x212   : > { %1243 = vmatprep.subr.bf16.mxu1 %v1927_v44  ;;  %1284 = vmatprep.subr.bf16.mxu0 %v2087_v9 }
 0x215   : > { %1244 = vmatpush1.bf16.msra.mxu1 %v1925_v45  ;;  %1285 = vmatpush1.bf16.msra.mxu0 %v1928_v46 }
 0x218   : > { %1250 = vmatmul.mubr.bf16.vlgmr.msra.gmra.mrb[4].mxu1 %v2352_v6  ;;  %1291 = vmatmul.mubr.bf16.vlgmr.msra.gmra.mrb[8].mxu0 %v2352_v6 }
 0x2b3   : > { %v1169_v56 = vpop.f32.mrb[0].mxu1  ;;  %v1210_v57 = vpop.f32.mrb[4].mxu0 }
 0x2b4   : > { %v1313_v9 = vadd.f32 %v1306_v52, %v1169_v56  ;;  %v1315_v58 = vadd.f32 %v1308_v53, %v1210_v57  ;;  %v1171_v59 = vpop.f32.mrb[1].mxu1  ;;  %v1212_v60 = vpop.f32.mrb[5].mxu0 }
 0x2b5   : > { %v1314_v61 = vadd.f32 %v1307_v54, %v1171_v59  ;;  %v1316_v62 = vadd.f32 %v1309_v55, %v1212_v60  ;;  %v1173_v63 = vpop.f32.mrb[2].mxu1  ;;  %v1214_v0 = vpop.f32.mrb[6].mxu0 }
 0x2b6   : > { %v1364_v2 = vmul.f32 %v1313_v9, %v1313_v9  ;;  %v1174_v1 = vpop.f32.mrb[3].mxu1  ;;  %v1215_v3 = vpop.f32.mrb[7].mxu0  ;;  %v1366_v8 = vmul.f32 %v1315_v58, %v1315_v58 }
 0x2b7   : > { %v1660_v4 = vpack.c.bf16 %v1314_v61, %v1313_v9  ;;  %v1354_v5 = vadd.f32 %v1314_v61, %v1313_v9  ;;  %v1365_v6 = vmul.f32 %v1314_v61, %v1314_v61  ;;  %v1661_v7 = vpack.c.bf16 %v1316_v62, %v1315_v58 }
 0x2b8   : > { %v1367_v13 = vmul.f32 %v1316_v62, %v1316_v62 }
 0x2b9   : > { %1349 = vst [vmem:[%s2380_s12] sm:$0xff] %v1660_v4  ;;  %v1371_v10 = vadd.f32 %v1365_v6, %v1364_v2  ;;  %1350 = vst [vmem:[%s2380_s12 + $0x8] sm:$0xff] %v1661_v7  ;;  %v1355_v11 = vadd.f32 %v1354_v5, %v1315_v58 }
 0x2bb   : > { %v1356_v12 = vadd.f32 %v1355_v11, %v1316_v62  ;;  %v1372_v14 = vadd.f32 %v1371_v10, %v1366_v8 }
 0x2bd   : > { %v1373_v15 = vadd.f32 %v1372_v14, %v1367_v13 }
 0x2eb   : > { %v1251_v22 = vpop.f32.mrb[4].mxu1  ;;  %v1292_v23 = vpop.f32.mrb[8].mxu0 }
 0x2ec   : > { %v1317_v24 = vadd.f32 %v1310_v19, %v1251_v22  ;;  %v1319_v25 = vadd.f32 %v1312_v20, %v1292_v23  ;;  %v1253_v26 = vpop.f32.mrb[5].mxu1  ;;  %v1294_v27 = vpop.f32.mrb[9].mxu0 }
 0x2ed   : > { %v1318_v28 = vadd.f32 %v1311_v21, %v1253_v26  ;;  %v1255_v29 = vpop.f32.mrb[6].mxu1  ;;  %v1295_v30 = vpop.f32.mrb[10].mxu0 }
 0x2ee   : > { %v1357_v31 = vadd.f32 %v1356_v12, %v1317_v24  ;;  %v1368_v32 = vmul.f32 %v1317_v24, %v1317_v24  ;;  %v1663_v33 = vpack.c.bf16 %v1319_v25, %v1319_v25  ;;  %v1256_v34 = vpop.f32.mrb[7].mxu1  ;;  %v1296_v35 = vpop.f32.mrb[11].mxu0  ;;  %v1370_v38 = vmul.f32 %v1319_v25, %v1319_v25 }
 0x2ef   : > { %v1662_v36 = vpack.c.bf16 %v1318_v28, %v1317_v24  ;;  %v1369_v37 = vmul.f32 %v1318_v28, %v1318_v28  ;;  %v1360_v41 = vsel %vm1359_vm12, %v1319_v25, 0.0 }
 0x2f0   : > { %1353 = vst.msk [vmem:[%s2380_s12 + $0x18] sm:$0xf] %vm1352_vm11, %v1663_v33  ;;  %v1358_v39 = vadd.f32 %v1357_v31, %v1318_v28  ;;  %v1374_v40 = vadd.f32 %v1373_v15, %v1368_v32  ;;  %v1376_v44 = vsel %vm1359_vm12, %v1370_v38, 0.0 }
 0x2f1   : > { %1351 = vst [vmem:[%s2380_s12 + $0x10] sm:$0xff] %v1662_v36 }
 0x2f2   : > { %v1361_v42 = vadd.f32 %v1360_v41, %v1358_v39  ;;  %v1375_v43 = vadd.f32 %v1374_v40, %v1369_v37 }
 0x2f4   : > { %1362 = vadd.xlane.f32.xlu1 %v1361_v42  ;;  %v1377_v45 = vadd.f32 %v1376_v44, %v1375_v43 }
 0x2f6   : > { %1378 = vadd.xlane.f32.xlu0 %v1377_v45 }
 0x2f7   : > { %2013 = shalt.err (!%p2010_p6)
}
 0x2f8   : > { %s2014_s28 = scalar_lea.hbm %s2394_s21, 448  ;;  %s2018_s19 = scalar_lea.hbm %s2442_s6, 896 }
 0x2f9   : > { %p2015_p7 = scmp.ne.s32.totalorder %s2394_s21, %s2014_s28  ;;  %p2019_p4 = scmp.lt.u32.totalorder %s2394_s21, %s2442_s6 }
 0x2fa   : > { %p2020_p8 = scmp.lt.u32.totalorder %s2018_s19, %s2014_s28  ;;  %p2022_p5 = scmp.lt.u32.totalorder %s2014_s28, %s2394_s21 }
 0x2fb   : > { %p2016_p12 = pnand %p2015_p7, %p2461_p13 }
 0x2fc   : > { %p2021_p0 = por %p2020_p8, %p2019_p4 }
 0x2fd   : > { %p2017_p9 = pneg %p2016_p12 }
 0x2fe   : > { %p2023_p3 = por %p2022_p5, %p2021_p0 }
 0x300   : > { %p2024_p11 = pnand %p2023_p3, %p2017_p9 }
 0x302   : > { %2027 = shalt.err (!%p2024_p11)
}
 0x303   : > { %1680 = dma.vmem_to_hbm [thread:$0]  (%p2461_p13), %s1404_s22, 448, %s2394_s21, %s1385_s10   ;;  %vm1380_vm13 = vcmask 7168   ;;  %vm1382_vm14 = vcmask 15360  }
 0x304   : > { %s1546_s0 = sshll.u32 %s2313_s29, 3 }
 0x305   : > { %s352_s17 = scalar_lea.vmem %s2443_s7, %s1546_s0 }
 0x381   : > { %v1363_v46 = vpop.xlane.xlu1 %1362 }
 0x383   : > { %v1379_v47 = vpop.xlane.xlu0 %1378 }
 0x384   : > { %v1381_v48 = vsel %vm1380_vm13, %v1363_v46, %v1379_v47 }
 0x385   : > { %1383 = vst.msk [vmem:[%s352_s17] sm:$0xff] %vm1382_vm14, %v1381_v48 }
 0x386 PF: > { %s1418_s11 = sand.u32 1, %s2062_s24   ;;  %p2462_p10 = scmp.ne.s32.totalorder %s2449_s8, 0 }
 0x387   : > { %p2463_p1 = scmp.ge.s32.totalorder %s2074_s27, 2  ;;  %s1419_s18 = scalar_lea.sflag [#allocation4], %s1418_s11 }
 0x389   : > { %p1694_p2 = pnand %p2463_p1, %p2462_p10 }
 0x38b   : > { %2057 = dma.done.wait (!%p1694_p2), %s1419_s18, 448  }
 0x38c   : > { %2059 = vsyncadd (!%p1694_p2), %s1419_s18, 4294966848  ;;  %p23_p13 = scmp.ge.s32.totalorder %s2187_s13, 4   ;;  %s2464_s24 = smov %s2066_s25 }
 0x38d   : > { %s2465_s25 = smov %s2070_s26  ;;  %s2466_s26 = smov %s2243_s16 }
 0x38e   : > { %s2467_s27 = smov %s2187_s13  ;;  %25 = sbr.rel (!%p23_p13) target bundleno = 9 (0x9), region = 114 }
 0x395   :  { %1431 = vsyncpa [#allocation3], 1 }
 0x396   :  { %1433 = vsyncpa [#allocation3 + $0x1], 1 }
 0x397   :  { %1434 = vsyncpa [#allocation8], 1 }
 0x398   :  { %1436 = vsyncpa [#allocation8 + $0x1], 1 }
 0x399   :  { %1437 = vsyncpa [#allocation4], 1 }
 0x39a   :  { %1439 = vsyncpa [#allocation4 + $0x1], 1 }
 0x39b   :  { %1440 = vsyncpa [#allocation5], 1 }
 0x39c   :  { %1442 = vsyncpa [#allocation5 + $0x1], 1 }

</bundles_post_ra>
